<compile_context>
chip_gen: v7x
topology: tpu7x:2x2x1
jax: 0.10.0
libtpu: 0.0.40
codegen_flags: <defaults>
</compile_context>

<pallas_src>
import functools

import jax
import jax.numpy as jnp
from jax.experimental import pallas as pl
from jax.experimental.pallas import tpu as pltpu


def _residual_block_kernel(N, L, eps,
                           x_ref, w1_ref, b1_ref, g1_ref, be1_ref,
                           w2_ref, b2_ref, g2_ref, be2_ref, alpha_ref,
                           o_ref):
    C = x_ref.shape[1]
    NL = N * L
    inv_nl = 1.0 / float(NL)
    alpha = alpha_ref[0, 0]                      # PReLU shared weight (scalar in SMEM)

    # In-VMEM swizzle NCL -> (C, N*L); lane-aligned concatenation since L % 128 == 0.
    x = jnp.concatenate([x_ref[n] for n in range(N)], axis=1)          # (C, NL)

    # Conv-tap edge masks, computed once.  The lane roll wraps across the flattened
    # N*L axis, but the wrapped positions are exactly the zero-padded ones
    # (l == 0 for the left tap, l == L-1 for the right tap), so masking restores
    # 'padding=1' semantics and also kills cross-sample leakage.
    l_pos = jax.lax.broadcasted_iota(jnp.int32, (C, NL), 1) % L
    m_left = (l_pos != 0).astype(jnp.float32)          # l-1 tap invalid at l == 0
    m_right = (l_pos != (L - 1)).astype(jnp.float32)   # l+1 tap invalid at l == L-1

    def conv3(h, w_ref, b_ref):
        # k=3, stride=1, pad=1 conv: shifted copies via XLU lane rolls (free-ish slot),
        # then ONE fused MXU matmul against the (Cout, 3*Cin) weight (taps k-major).
        h_m1 = pltpu.roll(h, shift=1, axis=1) * m_left          # h[:, nl-1]
        h_p1 = pltpu.roll(h, shift=NL - 1, axis=1) * m_right    # h[:, nl+1]
        stacked = jnp.concatenate([h_m1, h, h_p1], axis=0)      # (3C, NL)
        return jnp.dot(w_ref[...], stacked,
                       preferred_element_type=jnp.float32) + b_ref[...]

    def batchnorm(h, g_ref, be_ref):
        # training-mode BatchNorm1d: per-channel batch stats over (N, L), biased var.
        # Single read of h: sum and sum-of-squares with f32 accumulation.
        s = jnp.sum(h, axis=1, keepdims=True)
        ss = jnp.sum(h * h, axis=1, keepdims=True)
        mean = s * inv_nl
        var = jnp.maximum(ss * inv_nl - mean * mean, 0.0)
        scale = g_ref[...] * jax.lax.rsqrt(var + eps)
        return (h - mean) * scale + be_ref[...]

    def prelu(h):
        return jnp.where(h >= 0, h, alpha * h)

    out = prelu(batchnorm(conv3(x, w1_ref, b1_ref), g1_ref, be1_ref))
    out = batchnorm(conv3(out, w2_ref, b2_ref), g2_ref, be2_ref)
    out = prelu(out + x)                         # downsample is None -> identity is x

    # Scatter back to the (N, C, L) output layout (lane-dense stores, L % 128 == 0).
    for n in range(N):
        o_ref[n] = out[:, n * L:(n + 1) * L]


def residual_block_1d(x_ncl, params, eps=1e-5):
    """x_ncl: (N, C, L) as in PyTorch Conv1d.  Params in PyTorch layouts:
       w: (Cout, Cin, 3), b/gamma/beta: (C,), alpha: scalar.  Returns (N, C, L)."""
    w1, b1, g1, be1, w2, b2, g2, be2, alpha = params
    N, C, L = x_ncl.shape
    cout = w1.shape[0]

    def fuse_w(w):   # (Cout, Cin, 3) -> (Cout, 3*Cin), tap(k)-major rows
        return jnp.transpose(w, (0, 2, 1)).reshape(w.shape[0], -1).astype(jnp.float32)

    def col(v):      # per-channel vector -> (C, 1) column for (C, NL) broadcasting
        return v.reshape(-1, 1).astype(jnp.float32)

    vmem = pl.BlockSpec(memory_space=pltpu.MemorySpace.VMEM)
    smem = pl.BlockSpec(memory_space=pltpu.MemorySpace.SMEM)

    return pl.pallas_call(
        functools.partial(_residual_block_kernel, N, L, eps),
        out_shape=jax.ShapeDtypeStruct((N, cout, L), jnp.float32),
        in_specs=[vmem,                        # x (N, C, L)
                  vmem, vmem, vmem, vmem,      # w1 fused, b1, gamma1, beta1
                  vmem, vmem, vmem, vmem,      # w2 fused, b2, gamma2, beta2
                  smem],                       # prelu alpha (scalar)
        out_specs=vmem,
        # Explicit scoped-VMEM cap (usage at these shapes is a few hundred KB; this
        # simply raises v5e's 16 MiB default while staying under v7x's 64 MiB physical).
        compiler_params=pltpu.CompilerParams(vmem_limit_bytes=48 * 1024 * 1024),
    )(x_ncl.astype(jnp.float32),
      fuse_w(w1), col(b1), col(g1), col(be1),
      fuse_w(w2), col(b2), col(g2), col(be2),
      alpha.reshape(1, 1).astype(jnp.float32))


def residual_block_1d_reference(x_ncl, params, eps=1e-5):
    """Pure-JAX reference (PyTorch-faithful: lax.conv in NCW layout, training BN)."""
    w1, b1, g1, be1, w2, b2, g2, be2, alpha = params
    x = x_ncl.astype(jnp.float32)

    def conv(h, w, b):
        out = jax.lax.conv_general_dilated(
            h, w.astype(jnp.float32), window_strides=(1,), padding=((1, 1),),
            dimension_numbers=('NCH', 'OIH', 'NCH'))
        return out + b[None, :, None]

    def bn(h, g, be):
        mean = jnp.mean(h, axis=(0, 2), keepdims=True)
        var = jnp.mean((h - mean) ** 2, axis=(0, 2), keepdims=True)
        return g[None, :, None] * (h - mean) / jnp.sqrt(var + eps) + be[None, :, None]

    def prelu(h):
        return jnp.where(h >= 0, h, alpha * h)

    out = prelu(bn(conv(x, w1, b1), g1, be1))
    out = bn(conv(out, w2, b2), g2, be2)
    return prelu(out + x)


if __name__ == "__main__":
    # downsample=None requires in_channels == out_channels.
    # L chosen as a multiple of 128 so the lane axis is dense (unmasked stores).
    N, C, L = 4, 8, 128
    KSIZE = 3

    key = jax.random.PRNGKey(0)
    kx, kw1, kb1, kw2, kb2 = jax.random.split(key, 5)

    x = jax.random.normal(kx, (N, C, L), jnp.float32)

    # PyTorch Conv1d weight layout: (Cout, Cin, K)
    w1 = jax.random.normal(kw1, (C, C, KSIZE), jnp.float32) * 0.2
    b1 = jax.random.normal(kb1, (C,), jnp.float32) * 0.05
    w2 = jax.random.normal(kw2, (C, C, KSIZE), jnp.float32) * 0.2
    b2 = jax.random.normal(kb2, (C,), jnp.float32) * 0.05
    g1 = jnp.ones((C,), jnp.float32)      # BatchNorm default init
    be1 = jnp.zeros((C,), jnp.float32)
    g2 = jnp.ones((C,), jnp.float32)
    be2 = jnp.zeros((C,), jnp.float32)
    alpha = jnp.array(0.25, jnp.float32)  # nn.PReLU() default init

    params = (w1, b1, g1, be1, w2, b2, g2, be2, alpha)

    out = jax.block_until_ready(residual_block_1d(x, params))
    ref = jax.block_until_ready(residual_block_1d_reference(x, params))

    assert out.shape == (N, C, L)
    err = jnp.max(jnp.abs(out - ref))
    assert jnp.allclose(out, ref, rtol=1e-3, atol=1e-3), f"max abs err {err}"
    print("KERNEL_OK")
</pallas_src>

<mosaic_0001>
module attributes {stable_mosaic.version = 11 : i64} {
  func.func @_residual_block_kernel(%arg0: memref<4x8x128xf32, #tpu.memory_space<vmem>>, %arg1: memref<8x24xf32, #tpu.memory_space<vmem>>, %arg2: memref<8x1xf32, #tpu.memory_space<vmem>>, %arg3: memref<8x1xf32, #tpu.memory_space<vmem>>, %arg4: memref<8x1xf32, #tpu.memory_space<vmem>>, %arg5: memref<8x24xf32, #tpu.memory_space<vmem>>, %arg6: memref<8x1xf32, #tpu.memory_space<vmem>>, %arg7: memref<8x1xf32, #tpu.memory_space<vmem>>, %arg8: memref<8x1xf32, #tpu.memory_space<vmem>>, %arg9: memref<1x1xf32, #tpu.memory_space<smem>>, %arg10: memref<4x8x128xf32, #tpu.memory_space<vmem>>) attributes {dimension_semantics = [], scalar_prefetch = 0 : i64, scratch_operands = 0 : i64, tpu.core_type = #tpu.core_type<tc>} {
    %c0 = arith.constant 0 : index
    %c0_0 = arith.constant 0 : index
    %0 = memref.load %arg9[%c0, %c0_0] : memref<1x1xf32, #tpu.memory_space<smem>>
    %c0_1 = arith.constant 0 : index
    %c0_2 = arith.constant 0 : index
    %c0_3 = arith.constant 0 : index
    %1 = vector.load %arg0[%c0_1, %c0_2, %c0_3] : memref<4x8x128xf32, #tpu.memory_space<vmem>>, vector<1x8x128xf32>
    %2 = vector.shape_cast %1 : vector<1x8x128xf32> to vector<8x128xf32>
    %c1 = arith.constant 1 : index
    %c0_4 = arith.constant 0 : index
    %c0_5 = arith.constant 0 : index
    %3 = vector.load %arg0[%c1, %c0_4, %c0_5] : memref<4x8x128xf32, #tpu.memory_space<vmem>>, vector<1x8x128xf32>
    %4 = vector.shape_cast %3 : vector<1x8x128xf32> to vector<8x128xf32>
    %c2 = arith.constant 2 : index
    %c0_6 = arith.constant 0 : index
    %c0_7 = arith.constant 0 : index
    %5 = vector.load %arg0[%c2, %c0_6, %c0_7] : memref<4x8x128xf32, #tpu.memory_space<vmem>>, vector<1x8x128xf32>
    %6 = vector.shape_cast %5 : vector<1x8x128xf32> to vector<8x128xf32>
    %c3 = arith.constant 3 : index
    %c0_8 = arith.constant 0 : index
    %c0_9 = arith.constant 0 : index
    %7 = vector.load %arg0[%c3, %c0_8, %c0_9] : memref<4x8x128xf32, #tpu.memory_space<vmem>>, vector<1x8x128xf32>
    %8 = vector.shape_cast %7 : vector<1x8x128xf32> to vector<8x128xf32>
    %9 = tpu.concatenate %2, %4, %6, %8 in 1 : vector<8x128xf32>, vector<8x128xf32>, vector<8x128xf32>, vector<8x128xf32> -> vector<8x512xf32>
    %10 = tpu.iota {dimensions = array<i32: 1>} : vector<8x512xi32>
    %c128_i32 = arith.constant 128 : i32
    %c0_i32 = arith.constant 0 : i32
    %11 = arith.cmpi eq, %c128_i32, %c0_i32 : i32
    %c1_i32 = arith.constant 1 : i32
    %12 = arith.select %11, %c1_i32, %c128_i32 : i32
    %13 = vector.broadcast %12 : i32 to vector<8x512xi32>
    %14 = arith.remsi %10, %13 : vector<8x512xi32>
    %c0_i32_10 = arith.constant 0 : i32
    %15 = vector.broadcast %c0_i32_10 : i32 to vector<8x512xi32>
    %16 = arith.cmpi ne, %14, %15 : vector<8x512xi32>
    %c0_i32_11 = arith.constant 0 : i32
    %17 = vector.broadcast %c0_i32_11 : i32 to vector<8x512xi32>
    %18 = arith.cmpi slt, %14, %17 : vector<8x512xi32>
    %c0_i32_12 = arith.constant 0 : i32
    %19 = arith.cmpi slt, %12, %c0_i32_12 : i32
    %20 = vector.broadcast %19 : i1 to vector<8x512xi1>
    %21 = vector.broadcast %20 : vector<8x512xi1> to vector<8x512xi1>
    %22 = arith.xori %18, %21 : vector<8x512xi1>
    %23 = arith.andi %22, %16 : vector<8x512xi1>
    %24 = vector.broadcast %12 : i32 to vector<8x512xi32>
    %25 = arith.addi %14, %24 : vector<8x512xi32>
    %26 = arith.select %23, %25, %14 : vector<8x512xi1>, vector<8x512xi32>
    %c0_i32_13 = arith.constant 0 : i32
    %27 = vector.broadcast %c0_i32_13 : i32 to vector<8x512xi32>
    %28 = arith.cmpi ne, %26, %27 : vector<8x512xi32>
    %29 = arith.extui %28 : vector<8x512xi1> to vector<8x512xi32>
    %30 = arith.sitofp %29 : vector<8x512xi32> to vector<8x512xf32>
    %c127_i32 = arith.constant 127 : i32
    %31 = vector.broadcast %c127_i32 : i32 to vector<8x512xi32>
    %32 = arith.cmpi ne, %26, %31 : vector<8x512xi32>
    %33 = arith.extui %32 : vector<8x512xi1> to vector<8x512xi32>
    %34 = arith.sitofp %33 : vector<8x512xi32> to vector<8x512xf32>
    %c1_i32_14 = arith.constant 1 : i32
    %35 = tpu.dynamic_rotate %9 by %c1_i32_14 dim 1 : vector<8x512xf32>, i32 -> vector<8x512xf32>
    %36 = arith.mulf %35, %30 : vector<8x512xf32>
    %c511_i32 = arith.constant 511 : i32
    %37 = tpu.dynamic_rotate %9 by %c511_i32 dim 1 : vector<8x512xf32>, i32 -> vector<8x512xf32>
    %38 = arith.mulf %37, %34 : vector<8x512xf32>
    %39 = tpu.concatenate %36, %9, %38 in 0 : vector<8x512xf32>, vector<8x512xf32>, vector<8x512xf32> -> vector<24x512xf32>
    %c0_15 = arith.constant 0 : index
    %c0_16 = arith.constant 0 : index
    %40 = vector.load %arg1[%c0_15, %c0_16] : memref<8x24xf32, #tpu.memory_space<vmem>>, vector<8x24xf32>
    %cst = arith.constant dense<0.000000e+00> : vector<8x512xf32>
    %41 = tpu.matmul %40, %39, %cst {dimension_numbers = #tpu.dot_dimension_numbers<[1], [0], [0], [1], [0, 0, 1, 1], [], []>} : vector<8x24xf32>, vector<24x512xf32>, vector<8x512xf32> -> vector<8x512xf32>
    %c0_17 = arith.constant 0 : index
    %c0_18 = arith.constant 0 : index
    %42 = vector.load %arg2[%c0_17, %c0_18] : memref<8x1xf32, #tpu.memory_space<vmem>>, vector<8x1xf32>
    %43 = vector.broadcast %42 : vector<8x1xf32> to vector<8x512xf32>
    %44 = arith.addf %41, %43 : vector<8x512xf32>
    %cst_19 = arith.constant dense<0.000000e+00> : vector<8xf32>
    %45 = vector.multi_reduction <add>, %44, %cst_19 [1] : vector<8x512xf32> to vector<8xf32>
    %46 = vector.shape_cast %45 : vector<8xf32> to vector<8x1xf32>
    %47 = arith.mulf %44, %44 : vector<8x512xf32>
    %cst_20 = arith.constant dense<0.000000e+00> : vector<8xf32>
    %48 = vector.multi_reduction <add>, %47, %cst_20 [1] : vector<8x512xf32> to vector<8xf32>
    %49 = vector.shape_cast %48 : vector<8xf32> to vector<8x1xf32>
    %cst_21 = arith.constant 0.001953125 : f32
    %50 = vector.broadcast %cst_21 : f32 to vector<8x1xf32>
    %51 = arith.mulf %46, %50 : vector<8x1xf32>
    %cst_22 = arith.constant 0.001953125 : f32
    %52 = vector.broadcast %cst_22 : f32 to vector<8x1xf32>
    %53 = arith.mulf %49, %52 : vector<8x1xf32>
    %54 = arith.mulf %51, %51 : vector<8x1xf32>
    %55 = arith.subf %53, %54 : vector<8x1xf32>
    %cst_23 = arith.constant 0.000000e+00 : f32
    %56 = vector.broadcast %cst_23 : f32 to vector<8x1xf32>
    %57 = arith.maximumf %55, %56 : vector<8x1xf32>
    %c0_24 = arith.constant 0 : index
    %c0_25 = arith.constant 0 : index
    %58 = vector.load %arg3[%c0_24, %c0_25] : memref<8x1xf32, #tpu.memory_space<vmem>>, vector<8x1xf32>
    %cst_26 = arith.constant 9.99999974E-6 : f32
    %59 = vector.broadcast %cst_26 : f32 to vector<8x1xf32>
    %60 = arith.addf %57, %59 : vector<8x1xf32>
    %61 = math.rsqrt %60 : vector<8x1xf32>
    %62 = arith.mulf %58, %61 : vector<8x1xf32>
    %63 = vector.broadcast %51 : vector<8x1xf32> to vector<8x512xf32>
    %64 = arith.subf %44, %63 : vector<8x512xf32>
    %65 = vector.broadcast %62 : vector<8x1xf32> to vector<8x512xf32>
    %66 = arith.mulf %64, %65 : vector<8x512xf32>
    %c0_27 = arith.constant 0 : index
    %c0_28 = arith.constant 0 : index
    %67 = vector.load %arg4[%c0_27, %c0_28] : memref<8x1xf32, #tpu.memory_space<vmem>>, vector<8x1xf32>
    %68 = vector.broadcast %67 : vector<8x1xf32> to vector<8x512xf32>
    %69 = arith.addf %66, %68 : vector<8x512xf32>
    %cst_29 = arith.constant 0.000000e+00 : f32
    %70 = vector.broadcast %cst_29 : f32 to vector<8x512xf32>
    %71 = arith.cmpf oge, %69, %70 : vector<8x512xf32>
    %72 = vector.broadcast %0 : f32 to vector<8x512xf32>
    %73 = arith.mulf %72, %69 : vector<8x512xf32>
    %74 = arith.select %71, %69, %73 : vector<8x512xi1>, vector<8x512xf32>
    %c1_i32_30 = arith.constant 1 : i32
    %75 = tpu.dynamic_rotate %74 by %c1_i32_30 dim 1 : vector<8x512xf32>, i32 -> vector<8x512xf32>
    %76 = arith.mulf %75, %30 : vector<8x512xf32>
    %c511_i32_31 = arith.constant 511 : i32
    %77 = tpu.dynamic_rotate %74 by %c511_i32_31 dim 1 : vector<8x512xf32>, i32 -> vector<8x512xf32>
    %78 = arith.mulf %77, %34 : vector<8x512xf32>
    %79 = tpu.concatenate %76, %74, %78 in 0 : vector<8x512xf32>, vector<8x512xf32>, vector<8x512xf32> -> vector<24x512xf32>
    %c0_32 = arith.constant 0 : index
    %c0_33 = arith.constant 0 : index
    %80 = vector.load %arg5[%c0_32, %c0_33] : memref<8x24xf32, #tpu.memory_space<vmem>>, vector<8x24xf32>
    %cst_34 = arith.constant dense<0.000000e+00> : vector<8x512xf32>
    %81 = tpu.matmul %80, %79, %cst_34 {dimension_numbers = #tpu.dot_dimension_numbers<[1], [0], [0], [1], [0, 0, 1, 1], [], []>} : vector<8x24xf32>, vector<24x512xf32>, vector<8x512xf32> -> vector<8x512xf32>
    %c0_35 = arith.constant 0 : index
    %c0_36 = arith.constant 0 : index
    %82 = vector.load %arg6[%c0_35, %c0_36] : memref<8x1xf32, #tpu.memory_space<vmem>>, vector<8x1xf32>
    %83 = vector.broadcast %82 : vector<8x1xf32> to vector<8x512xf32>
    %84 = arith.addf %81, %83 : vector<8x512xf32>
    %cst_37 = arith.constant dense<0.000000e+00> : vector<8xf32>
    %85 = vector.multi_reduction <add>, %84, %cst_37 [1] : vector<8x512xf32> to vector<8xf32>
    %86 = vector.shape_cast %85 : vector<8xf32> to vector<8x1xf32>
    %87 = arith.mulf %84, %84 : vector<8x512xf32>
    %cst_38 = arith.constant dense<0.000000e+00> : vector<8xf32>
    %88 = vector.multi_reduction <add>, %87, %cst_38 [1] : vector<8x512xf32> to vector<8xf32>
    %89 = vector.shape_cast %88 : vector<8xf32> to vector<8x1xf32>
    %cst_39 = arith.constant 0.001953125 : f32
    %90 = vector.broadcast %cst_39 : f32 to vector<8x1xf32>
    %91 = arith.mulf %86, %90 : vector<8x1xf32>
    %cst_40 = arith.constant 0.001953125 : f32
    %92 = vector.broadcast %cst_40 : f32 to vector<8x1xf32>
    %93 = arith.mulf %89, %92 : vector<8x1xf32>
    %94 = arith.mulf %91, %91 : vector<8x1xf32>
    %95 = arith.subf %93, %94 : vector<8x1xf32>
    %cst_41 = arith.constant 0.000000e+00 : f32
    %96 = vector.broadcast %cst_41 : f32 to vector<8x1xf32>
    %97 = arith.maximumf %95, %96 : vector<8x1xf32>
    %c0_42 = arith.constant 0 : index
    %c0_43 = arith.constant 0 : index
    %98 = vector.load %arg7[%c0_42, %c0_43] : memref<8x1xf32, #tpu.memory_space<vmem>>, vector<8x1xf32>
    %cst_44 = arith.constant 9.99999974E-6 : f32
    %99 = vector.broadcast %cst_44 : f32 to vector<8x1xf32>
    %100 = arith.addf %97, %99 : vector<8x1xf32>
    %101 = math.rsqrt %100 : vector<8x1xf32>
    %102 = arith.mulf %98, %101 : vector<8x1xf32>
    %103 = vector.broadcast %91 : vector<8x1xf32> to vector<8x512xf32>
    %104 = arith.subf %84, %103 : vector<8x512xf32>
    %105 = vector.broadcast %102 : vector<8x1xf32> to vector<8x512xf32>
    %106 = arith.mulf %104, %105 : vector<8x512xf32>
    %c0_45 = arith.constant 0 : index
    %c0_46 = arith.constant 0 : index
    %107 = vector.load %arg8[%c0_45, %c0_46] : memref<8x1xf32, #tpu.memory_space<vmem>>, vector<8x1xf32>
    %108 = vector.broadcast %107 : vector<8x1xf32> to vector<8x512xf32>
    %109 = arith.addf %106, %108 : vector<8x512xf32>
    %110 = arith.addf %109, %9 : vector<8x512xf32>
    %cst_47 = arith.constant 0.000000e+00 : f32
    %111 = vector.broadcast %cst_47 : f32 to vector<8x512xf32>
    %112 = arith.cmpf oge, %110, %111 : vector<8x512xf32>
    %113 = vector.broadcast %0 : f32 to vector<8x512xf32>
    %114 = arith.mulf %113, %110 : vector<8x512xf32>
    %115 = arith.select %112, %110, %114 : vector<8x512xi1>, vector<8x512xf32>
    %116 = vector.extract_strided_slice %115 {offsets = [0, 0], sizes = [8, 128], strides = [1, 1]} : vector<8x512xf32> to vector<8x128xf32>
    %c0_48 = arith.constant 0 : index
    %c0_49 = arith.constant 0 : index
    %c0_50 = arith.constant 0 : index
    %117 = vector.load %arg10[%c0_48, %c0_49, %c0_50] : memref<4x8x128xf32, #tpu.memory_space<vmem>>, vector<1x8x128xf32>
    %118 = vector.shape_cast %117 : vector<1x8x128xf32> to vector<8x128xf32>
    %119 = vector.shape_cast %116 : vector<8x128xf32> to vector<1x8x128xf32>
    tpu.vector_store %arg10[%c0_48, %c0_49, %c0_50], %119 {strides = array<i32>} : memref<4x8x128xf32, #tpu.memory_space<vmem>>, vector<1x8x128xf32>,
    %120 = vector.extract_strided_slice %115 {offsets = [0, 128], sizes = [8, 128], strides = [1, 1]} : vector<8x512xf32> to vector<8x128xf32>
    %c1_51 = arith.constant 1 : index
    %c0_52 = arith.constant 0 : index
    %c0_53 = arith.constant 0 : index
    %121 = vector.load %arg10[%c1_51, %c0_52, %c0_53] : memref<4x8x128xf32, #tpu.memory_space<vmem>>, vector<1x8x128xf32>
    %122 = vector.shape_cast %121 : vector<1x8x128xf32> to vector<8x128xf32>
    %123 = vector.shape_cast %120 : vector<8x128xf32> to vector<1x8x128xf32>
    tpu.vector_store %arg10[%c1_51, %c0_52, %c0_53], %123 {strides = array<i32>} : memref<4x8x128xf32, #tpu.memory_space<vmem>>, vector<1x8x128xf32>,
    %124 = vector.extract_strided_slice %115 {offsets = [0, 256], sizes = [8, 128], strides = [1, 1]} : vector<8x512xf32> to vector<8x128xf32>
    %c2_54 = arith.constant 2 : index
    %c0_55 = arith.constant 0 : index
    %c0_56 = arith.constant 0 : index
    %125 = vector.load %arg10[%c2_54, %c0_55, %c0_56] : memref<4x8x128xf32, #tpu.memory_space<vmem>>, vector<1x8x128xf32>
    %126 = vector.shape_cast %125 : vector<1x8x128xf32> to vector<8x128xf32>
    %127 = vector.shape_cast %124 : vector<8x128xf32> to vector<1x8x128xf32>
    tpu.vector_store %arg10[%c2_54, %c0_55, %c0_56], %127 {strides = array<i32>} : memref<4x8x128xf32, #tpu.memory_space<vmem>>, vector<1x8x128xf32>,
    %128 = vector.extract_strided_slice %115 {offsets = [0, 384], sizes = [8, 128], strides = [1, 1]} : vector<8x512xf32> to vector<8x128xf32>
    %c3_57 = arith.constant 3 : index
    %c0_58 = arith.constant 0 : index
    %c0_59 = arith.constant 0 : index
    %129 = vector.load %arg10[%c3_57, %c0_58, %c0_59] : memref<4x8x128xf32, #tpu.memory_space<vmem>>, vector<1x8x128xf32>
    %130 = vector.shape_cast %129 : vector<1x8x128xf32> to vector<8x128xf32>
    %131 = vector.shape_cast %128 : vector<8x128xf32> to vector<1x8x128xf32>
    tpu.vector_store %arg10[%c3_57, %c0_58, %c0_59], %131 {strides = array<i32>} : memref<4x8x128xf32, #tpu.memory_space<vmem>>, vector<1x8x128xf32>,
    return
  }
}

</mosaic_0001>

<bundles_post_ra>
// kernel: tpu_custom_call.1
= control target key start
LH: loop header
LB: loop body
LE: loop exit
PB: predicated region body
PF: predicated region fallthrough
CT: control target
= control target key end

     0   :  { %s705_s17 = smov 1   ;;  %s957_s0 = inlined_call_operand.vmem [shape: f32[4,8,128], index: 0, kind: input, shape index: {}]   ;;  %s958_s1 = inlined_call_operand.vmem [shape: f32[8,24], index: 1, kind: input, shape index: {}]   ;;  %s959_s2 = inlined_call_operand.vmem [shape: f32[8,1], index: 2, kind: input, shape index: {}]   ;;  %s960_s3 = inlined_call_operand.vmem [shape: f32[8,1], index: 3, kind: input, shape index: {}]   ;;  %s961_s4 = inlined_call_operand.vmem [shape: f32[8,1], index: 4, kind: input, shape index: {}]   ;;  %s962_s5 = inlined_call_operand.vmem [shape: f32[8,24], index: 5, kind: input, shape index: {}]   ;;  %s963_s6 = inlined_call_operand.vmem [shape: f32[8,1], index: 6, kind: input, shape index: {}]   ;;  %s964_s7 = inlined_call_operand.vmem [shape: f32[8,1], index: 7, kind: input, shape index: {}]   ;;  %s965_s8 = inlined_call_operand.vmem [shape: f32[8,1], index: 8, kind: input, shape index: {}]   ;;  %s966_s9 = inlined_call_operand.<no memory space> [shape: f32[1,1], index: 9, kind: input, shape index: {}]   ;;  %s967_s10 = inlined_call_operand.hbm [shape: f32[4,8,128], index: 10, kind: output, shape index: {}]  }
   0x1   :  { %v770_v0 = vld [vmem:[%s957_s0 + $0x18] sm:$0xff]  ;;  %v775_v1 = vld [vmem:[%s957_s0] sm:$0xff] }
   0x2   :  { %128 = vrot.lane.b32.xlu1 %v770_v0, %s705_s17  ;;  %122 = vrot.lane.b32.xlu0 %v775_v1, %s705_s17 }
   0x3   :  { %16 = vsyncpa [#allocation4], 0  ;;  %v784_v2 = vld [vmem:[%s957_s0 + $0x10] sm:$0xff]  ;;  %v789_v3 = vld [vmem:[%s957_s0 + $0x8] sm:$0xff]  ;;  %v706_v4 = vmov 0.0   ;;  %v707_v5 = vmov 0   ;;  %v45_v7 = vlaneseq }
   0x4   :  { %231 = vmatprep.mubr.f32.mxu0 %v706_v4  ;;  %302 = vmatprep.mubr.f32.mxu1 %v706_v4  ;;  %s708_s22 = smov 127   ;;  %v157_v6 = vld [vmem:[%s959_s2] sm:$0xff]  ;;  %vm163_vm10 = vcmask 195584  }
   0x5   :  { %675 = vset.pattern.permute.xlu0 %v707_v5  ;;  %676 = vset.pattern.permute.xlu1 %v707_v5  ;;  %v808_v8 = vand.u32 127, %v45_v7  ;;  %v156_v51 = vld [vmem:[%s958_s1] sm:$0xff] }
   0x6   :  { %126 = vrot.lane.b32.xlu1 %v784_v2, %s705_s17  ;;  %124 = vrot.lane.b32.xlu0 %v789_v3, %s705_s17 }
   0x7   :  { %v48_v9 = vadd.s32 256, %v808_v8  ;;  %v47_v10 = vadd.s32 128, %v808_v8  ;;  %v49_v11 = vadd.s32 384, %v808_v8  ;;  %vm98_vm0 = vcmp.ne.s32.totalorder %v808_v8, 0 }
   0x8   :  { %vm130_vm1 = vcmp.lt.s32.totalorder %v808_v8, 1  ;;  %v816_v17 = vsel %vm98_vm0, 1.0, %v706_v4  ;;  %vm147_vm6 = vcmp.lt.s32.totalorder %v808_v8, 127  ;;  %vm110_vm8 = vcmp.ne.s32.totalorder %v808_v8, 127 }
   0x9   :  { %v68_v12 = vand.u32 127, %v48_v9  ;;  %v61_v13 = vand.u32 127, %v47_v10  ;;  %v75_v14 = vand.u32 127, %v49_v11  ;;  %v855_v41 = vsel %vm110_vm8, 1.0, %v706_v4 }
   0xa   :  { %143 = vrot.lane.b32.xlu1 %v784_v2, %s708_s22  ;;  %141 = vrot.lane.b32.xlu0 %v789_v3, %s708_s22 }
   0xb   :  { %vm100_vm2 = vcmp.ne.s32.totalorder %v68_v12, 0  ;;  %vm99_vm3 = vcmp.ne.s32.totalorder %v61_v13, 0  ;;  %vm101_vm4 = vcmp.ne.s32.totalorder %v75_v14, 0  ;;  %vm111_vm5 = vcmp.ne.s32.totalorder %v61_v13, 127 }
   0xc   :  { %v821_v19 = vsel %vm100_vm2, 1.0, %v706_v4  ;;  %v824_v20 = vsel %vm99_vm3, 1.0, %v706_v4  ;;  %v827_v21 = vsel %vm101_vm4, 1.0, %v706_v4  ;;  %v841_v31 = vsel %vm111_vm5, 1.0, %v706_v4 }
   0xd   :  { %vm112_vm7 = vcmp.ne.s32.totalorder %v68_v12, 127  ;;  %vm113_vm9 = vcmp.ne.s32.totalorder %v75_v14, 127  ;;  %v345_v12 = vld [vmem:[%s961_s4] sm:$0xff] }
   0xe   :  { %145 = vrot.lane.b32.xlu1 %v770_v0, %s708_s22  ;;  %139 = vrot.lane.b32.xlu0 %v775_v1, %s708_s22  ;;  %v852_v40 = vsel %vm112_vm7, 1.0, %v706_v4  ;;  %v858_v42 = vsel %vm113_vm9, 1.0, %v706_v4 }
  0x12   :  { %160 = vperm.xlu0 %675, %v157_v6  }
  0x74   :  { %v129_v15 = vpop.permute.xlu1 %128  ;;  %v123_v16 = vpop.permute.xlu0 %122 }
  0x75   :  { %v134_v18 = vsel %vm130_vm1, %v129_v15, %v123_v16 }
  0x76   :  { %v135_v24 = vmul.f32 %v816_v17, %v134_v18 }
  0x78   :  { %v127_v22 = vpop.permute.xlu1 %126  ;;  %v125_v23 = vpop.permute.xlu0 %124  ;;  %v654_v38 = vpack.c.bf16 %v775_v1, %v135_v24 }
  0x79   :  { %v131_v25 = vsel %vm130_vm1, %v127_v22, %v129_v15  ;;  %v132_v26 = vsel %vm130_vm1, %v125_v23, %v127_v22  ;;  %v133_v27 = vsel %vm130_vm1, %v123_v16, %v125_v23 }
  0x7a   :  { %v137_v28 = vmul.f32 %v821_v19, %v132_v26  ;;  %v136_v29 = vmul.f32 %v824_v20, %v133_v27  ;;  %v138_v30 = vmul.f32 %v827_v21, %v131_v25  ;;  %v328_v25 = vld [vmem:[%s960_s3] sm:$0xff] }
  0x7c   :  { %v144_v32 = vpop.permute.xlu1 %143  ;;  %v142_v33 = vpop.permute.xlu0 %141  ;;  %v652_v34 = vpack.c.bf16 %v789_v3, %v136_v29  ;;  %v656_v35 = vpack.c.bf16 %v770_v0, %v138_v30  ;;  %v658_v36 = vpack.c.bf16 %v784_v2, %v137_v28 }
  0x7d   :  { %v149_v37 = vsel %vm147_vm6, %v142_v33, %v144_v32 }
  0x7e   :  { %v153_v39 = vmul.f32 %v841_v31, %v149_v37  ;;  %653 = vmatprep.subr.bf16.mxu0 %v652_v34  ;;  %657 = vmatprep.subr.bf16.mxu1 %v656_v35 }
  0x7f   :  { %655 = vmatpush1.bf16.msra.mxu0 %v654_v38  ;;  %659 = vmatpush1.bf16.msra.mxu1 %v658_v36  ;;  %v885_v38 = vstv %s966_s9 }
  0x80   :  { %v146_v43 = vpop.permute.xlu1 %145  ;;  %171 = vmatprep.subr.mxu0 %v153_v39  ;;  %v140_v44 = vpop.permute.xlu0 %139 }
  0x81   :  { %v148_v45 = vsel %vm147_vm6, %v144_v32, %v146_v43  ;;  %v150_v46 = vsel %vm147_vm6, %v140_v44, %v142_v33  ;;  %v151_v47 = vsel %vm147_vm6, %v146_v43, %v140_v44 }
  0x82   :  { %v154_v48 = vmul.f32 %v852_v40, %v148_v45  ;;  %v152_v49 = vmul.f32 %v855_v41, %v150_v46  ;;  %v155_v50 = vmul.f32 %v858_v42, %v151_v47 }
  0x84   :  { %172 = vmatpush1.msra.mxu0 %v152_v49  ;;  %242 = vmatprep.subr.mxu1 %v155_v50 }
  0x85   :  { %648 = vmatmul.mubr.msk.f32.vlgmr.msra.gmra.mrb[0].mxu0 %vm163_vm10, %v156_v51  ;;  %243 = vmatpush1.msra.mxu1 %v154_v48 }
  0x86   :  { %649 = vmatmul.mubr.msk.f32.vlgmr.msra.gmra.mrb[0].mxu1 %vm163_vm10, %v156_v51  ;;  %474 = vmatprep.mubr.f32.mxu0 %v706_v4 }
  0x87   :  { %545 = vmatprep.mubr.f32.mxu1 %v706_v4 }
  0x91   :  { %v161_v52 = vpop.permute.xlu0 %160 }
 0x158   :  { %v233_v53 = vpop.f32.mrb[0].mxu0 }
 0x159   :  { %v234_v54 = vadd.f32 %v233_v53, %v161_v52  ;;  %v235_v55 = vpop.f32.mrb[1].mxu0  ;;  %v304_v56 = vpop.f32.mrb[0].mxu1 }
 0x15a   :  { %v236_v57 = vadd.f32 %v235_v55, %v161_v52  ;;  %v305_v58 = vadd.f32 %v304_v56, %v161_v52  ;;  %v306_v59 = vpop.f32.mrb[1].mxu1  ;;  %v401_v55 = vld [vmem:[%s963_s6] sm:$0xff] }
 0x15b   :  { %v314_v60 = vmul.f32 %v234_v54, %v234_v54  ;;  %v307_v63 = vadd.f32 %v306_v59, %v161_v52 }
 0x15c   :  { %v309_v61 = vadd.f32 %v236_v57, %v234_v54  ;;  %v315_v62 = vmul.f32 %v236_v57, %v236_v57  ;;  %v316_v5 = vmul.f32 %v305_v58, %v305_v58 }
 0x15d   :  { %v317_v10 = vmul.f32 %v307_v63, %v307_v63 }
 0x15e   :  { %v310_v6 = vadd.f32 %v309_v61, %v305_v58  ;;  %v318_v7 = vadd.f32 %v315_v62, %v314_v60 }
 0x160   :  { %v311_v9 = vadd.f32 %v310_v6, %v307_v63  ;;  %v319_v11 = vadd.f32 %v318_v7, %v316_v5 }
 0x162   :  { %312 = vadd.xlane.f32.xlu1 %v311_v9  ;;  %v320_v4 = vadd.f32 %v319_v11, %v317_v10 }
 0x164   :  { %321 = vadd.xlane.f32.xlu0 %v320_v4 }
 0x17a   :  { %348 = vperm.xlu0 %675, %v345_v12  }
 0x1ef   :  { %v313_v13 = vpop.xlane.xlu1 %312 }
 0x1f0   :  { %v323_v14 = vmul.f32 0.001953125, %v313_v13 }
 0x1f1   :  { %v322_v15 = vpop.xlane.xlu0 %321 }
 0x1f2   :  { %v324_v16 = vmul.f32 0.001953125, %v322_v15  ;;  %v325_v18 = vmul.f32 %v323_v14, %v323_v14  ;;  %v332_v28 = vsub.f32 %v234_v54, %v323_v14  ;;  %v333_v29 = vsub.f32 %v236_v57, %v323_v14 }
 0x1f3   :  { %v335_v30 = vsub.f32 %v307_v63, %v323_v14  ;;  %v334_v33 = vsub.f32 %v305_v58, %v323_v14 }
 0x1f4   :  { %v326_v22 = vsub.f32 %v324_v16, %v325_v18 }
 0x1f6   :  { %v327_v23 = vmax.f32 %v326_v22, 0.0 }
 0x1f8   :  { %v329_v24 = vadd.f32 1e-05, %v327_v23 }
 0x1f9   :  { %v349_v37 = vpop.permute.xlu0 %348 }
 0x1fa   :  { %677 = vrsqrt.f32 %v329_v24 }
 0x204   :  { %v678_v26 = vpop.eup %677 }
 0x205   :  { %v331_v27 = vmul.f32 %v678_v26, %v328_v25 }
 0x207   :  { %338 = vperm.xlu1 %676, %v331_v27  }
 0x286   :  { %v339_v32 = vpop.permute.xlu1 %338 }
 0x287   :  { %v341_v34 = vmul.f32 %v339_v32, %v332_v28  ;;  %v342_v35 = vmul.f32 %v339_v32, %v333_v29  ;;  %v344_v36 = vmul.f32 %v339_v32, %v335_v30  ;;  %v343_v39 = vmul.f32 %v339_v32, %v334_v33 }
 0x289   :  { %v354_v43 = vadd.f32 %v349_v37, %v344_v36  ;;  %v351_v44 = vadd.f32 %v349_v37, %v341_v34  ;;  %v352_v45 = vadd.f32 %v349_v37, %v342_v35  ;;  %v353_v51 = vadd.f32 %v349_v37, %v343_v39 }
 0x28b   :  { %vm358_vm11 = vcmp.ge.f32.partialorder %v354_v43, 0.0  ;;  %v363_v46 = vmul.f32 %v885_v38, %v354_v43  ;;  %vm355_vm12 = vcmp.ge.f32.partialorder %v351_v44, 0.0  ;;  %v360_v47 = vmul.f32 %v885_v38, %v351_v44 }
 0x28c   :  { %v361_v50 = vmul.f32 %v885_v38, %v352_v45  ;;  %vm356_vm13 = vcmp.ge.f32.partialorder %v352_v45, 0.0  ;;  %v362_v53 = vmul.f32 %v885_v38, %v353_v51  ;;  %vm357_vm14 = vcmp.ge.f32.partialorder %v353_v51, 0.0 }
 0x28d   :  { %v367_v48 = vsel %vm358_vm11, %v354_v43, %v363_v46  ;;  %v364_v49 = vsel %vm355_vm12, %v351_v44, %v360_v47 }
 0x28e   :  { %374 = vrot.lane.b32.xlu0 %v367_v48, %s705_s17  ;;  %368 = vrot.lane.b32.xlu1 %v364_v49, %s705_s17  ;;  %v365_v52 = vsel %vm356_vm13, %v352_v45, %v361_v50  ;;  %v366_v54 = vsel %vm357_vm14, %v353_v51, %v362_v53  ;;  %v588_v45 = vld [vmem:[%s965_s8] sm:$0xff] }
 0x292   :  { %386 = vrot.lane.b32.xlu0 %v365_v52, %s708_s22  ;;  %370 = vrot.lane.b32.xlu1 %v365_v52, %s705_s17 }
 0x296   :  { %384 = vrot.lane.b32.xlu0 %v364_v49, %s708_s22  ;;  %372 = vrot.lane.b32.xlu1 %v366_v54, %s705_s17 }
 0x29a   :  { %404 = vperm.xlu0 %675, %v401_v55   ;;  %388 = vrot.lane.b32.xlu1 %v366_v54, %s708_s22 }
 0x29e   :  { %390 = vrot.lane.b32.xlu1 %v367_v48, %s708_s22 }
 0x300   :  { %v375_v56 = vpop.permute.xlu0 %374  ;;  %v369_v57 = vpop.permute.xlu1 %368 }
 0x301   :  { %v379_v58 = vsel %vm130_vm1, %v375_v56, %v369_v57 }
 0x302   :  { %v380_v61 = vmul.f32 %v816_v17, %v379_v58 }
 0x304   :  { %v387_v59 = vpop.permute.xlu0 %386  ;;  %v371_v60 = vpop.permute.xlu1 %370  ;;  %v662_v7 = vpack.c.bf16 %v364_v49, %v380_v61 }
 0x305   :  { %v378_v62 = vsel %vm130_vm1, %v369_v57, %v371_v60 }
 0x306   :  { %v381_v63 = vmul.f32 %v824_v20, %v378_v62 }
 0x308   :  { %v373_v5 = vpop.permute.xlu1 %372  ;;  %v660_v6 = vpack.c.bf16 %v365_v52, %v381_v63  ;;  %v385_v9 = vpop.permute.xlu0 %384 }
 0x309   :  { %v376_v10 = vsel %vm130_vm1, %v373_v5, %v375_v56  ;;  %v377_v11 = vsel %vm130_vm1, %v371_v60, %v373_v5  ;;  %v394_v17 = vsel %vm147_vm6, %v385_v9, %v387_v59 }
 0x30a   :  { %v382_v4 = vmul.f32 %v821_v19, %v377_v11  ;;  %v383_v12 = vmul.f32 %v827_v21, %v376_v10  ;;  %661 = vmatprep.subr.bf16.mxu0 %v660_v6  ;;  %v396_v18 = vmul.f32 %v855_v41, %v394_v17  ;;  %v400_v19 = vld [vmem:[%s962_s5] sm:$0xff] }
 0x30b   :  { %663 = vmatpush1.bf16.msra.mxu0 %v662_v7 }
 0x30c   :  { %v666_v20 = vpack.c.bf16 %v366_v54, %v382_v4  ;;  %v389_v13 = vpop.permute.xlu1 %388  ;;  %v664_v14 = vpack.c.bf16 %v367_v48, %v383_v12  ;;  %v571_v54 = vld [vmem:[%s964_s7] sm:$0xff]  ;;  %s709_s7 = smov [#allocation3]  }
 0x30d   :  { %v393_v15 = vsel %vm147_vm6, %v387_v59, %v389_v13  ;;  %s626_s8 = sshll.u32 %s709_s7, 4  ;;  %s627_s8 = int_to_ptr.vmem [resolvable:$true] %s626_s8 }
 0x30e   :  { %v397_v16 = vmul.f32 %v841_v31, %v393_v15  ;;  %665 = vmatprep.subr.bf16.mxu1 %v664_v14  ;;  %s681_s13 = scalar_lea.vmem %s627_s8, 512  ;;  %p686_p1 = scmp.lt.s32.totalorder %s627_s8, %s627_s8 }
 0x30f   :  { %667 = vmatpush1.bf16.msra.mxu1 %v666_v20  ;;  %p682_p0 = scmp.ne.s32.totalorder %s627_s8, %s681_s13  ;;  %p687_p2 = scmp.lt.s32.totalorder %s681_s13, %s681_s13 }
 0x310   :  { %414 = vmatprep.subr.mxu0 %v397_v16  ;;  %v391_v21 = vpop.permute.xlu1 %390 }
 0x311   :  { %v392_v22 = vsel %vm147_vm6, %v389_v13, %v391_v21  ;;  %v395_v23 = vsel %vm147_vm6, %v391_v21, %v385_v9  ;;  %415 = vmatpush1.msra.mxu0 %v396_v18  ;;  %p688_p3 = por %p687_p2, %p686_p1 }
 0x312   :  { %v398_v24 = vmul.f32 %v852_v40, %v392_v22  ;;  %v399_v31 = vmul.f32 %v858_v42, %v395_v23  ;;  %650 = vmatmul.mubr.msk.f32.vlgmr.msra.gmra.mrb[2].mxu0 %vm163_vm10, %v400_v19 }
 0x313   :  { %p689_p4 = pnand %p688_p3, %p682_p0 }
 0x314   :  { %485 = vmatprep.subr.mxu1 %v399_v31 }
 0x315   :  { %486 = vmatpush1.msra.mxu1 %v398_v24 }
 0x316   :  { %651 = vmatmul.mubr.msk.f32.vlgmr.msra.gmra.mrb[2].mxu1 %vm163_vm10, %v400_v19 }
 0x319   :  { %v405_v41 = vpop.permute.xlu0 %404 }
 0x3e5   :  { %v476_v25 = vpop.f32.mrb[2].mxu0 }
 0x3e6   :  { %v477_v26 = vadd.f32 %v476_v25, %v405_v41  ;;  %v478_v27 = vpop.f32.mrb[3].mxu0 }
 0x3e7   :  { %v479_v28 = vadd.f32 %v478_v27, %v405_v41 }
 0x3e8   :  { %v557_v29 = vmul.f32 %v477_v26, %v477_v26 }
 0x3e9   :  { %v552_v30 = vadd.f32 %v479_v28, %v477_v26  ;;  %v558_v8 = vmul.f32 %v479_v28, %v479_v28  ;;  %v547_v32 = vpop.f32.mrb[2].mxu1 }
 0x3ea   :  { %v548_v33 = vadd.f32 %v547_v32, %v405_v41  ;;  %v549_v34 = vpop.f32.mrb[3].mxu1 }
 0x3eb   :  { %v550_v40 = vadd.f32 %v549_v34, %v405_v41  ;;  %v561_v35 = vadd.f32 %v558_v8, %v557_v29 }
 0x3ec   :  { %v559_v42 = vmul.f32 %v548_v33, %v548_v33  ;;  %v553_v36 = vadd.f32 %v552_v30, %v548_v33 }
 0x3ed   :  { %v560_v37 = vmul.f32 %v550_v40, %v550_v40 }
 0x3ee   :  { %v554_v39 = vadd.f32 %v553_v36, %v550_v40  ;;  %v562_v43 = vadd.f32 %v561_v35, %v559_v42 }
 0x3f0   :  { %555 = vadd.xlane.f32.xlu1 %v554_v39  ;;  %v563_v44 = vadd.f32 %v562_v43, %v560_v37 }
 0x3f2   :  { %564 = vadd.xlane.f32.xlu0 %v563_v44 }
 0x401   :  { %591 = vperm.xlu1 %676, %v588_v45  }
 0x47d   :  { %v556_v46 = vpop.xlane.xlu1 %555 }
 0x47e   :  { %v566_v47 = vmul.f32 0.001953125, %v556_v46 }
 0x47f   :  { %v565_v48 = vpop.xlane.xlu0 %564 }
 0x480   :  { %v567_v49 = vmul.f32 0.001953125, %v565_v48  ;;  %v568_v50 = vmul.f32 %v566_v47, %v566_v47  ;;  %v575_v57 = vsub.f32 %v477_v26, %v566_v47  ;;  %v576_v58 = vsub.f32 %v479_v28, %v566_v47 }
 0x481   :  { %v577_v59 = vsub.f32 %v548_v33, %v566_v47  ;;  %v578_v60 = vsub.f32 %v550_v40, %v566_v47  ;;  %v592_v7 = vpop.permute.xlu1 %591 }
 0x482   :  { %v569_v51 = vsub.f32 %v567_v49, %v568_v50 }
 0x484   :  { %v570_v52 = vmax.f32 %v569_v51, 0.0 }
 0x486   :  { %v572_v53 = vadd.f32 1e-05, %v570_v52 }
 0x488   :  { %679 = vrsqrt.f32 %v572_v53 }
 0x492   :  { %v680_v55 = vpop.eup %679 }
 0x493   :  { %v574_v56 = vmul.f32 %v680_v55, %v571_v54 }
 0x495   :  { %581 = vperm.xlu0 %675, %v574_v56  }
 0x514   :  { %v582_v61 = vpop.permute.xlu0 %581 }
 0x515   :  { %v584_v62 = vmul.f32 %v582_v61, %v575_v57  ;;  %v585_v63 = vmul.f32 %v582_v61, %v576_v58  ;;  %v586_v5 = vmul.f32 %v582_v61, %v577_v59  ;;  %v587_v6 = vmul.f32 %v582_v61, %v578_v60 }
 0x517   :  { %v594_v9 = vadd.f32 %v592_v7, %v584_v62  ;;  %v595_v10 = vadd.f32 %v592_v7, %v585_v63  ;;  %v596_v11 = vadd.f32 %v592_v7, %v586_v5  ;;  %v597_v4 = vadd.f32 %v592_v7, %v587_v6 }
 0x519   :  { %v598_v12 = vadd.f32 %v594_v9, %v775_v1  ;;  %v599_v17 = vadd.f32 %v789_v3, %v595_v10  ;;  %v600_v20 = vadd.f32 %v784_v2, %v596_v11  ;;  %v601_v13 = vadd.f32 %v770_v0, %v597_v4 }
 0x51b   :  { %vm602_vm15 = vcmp.ge.f32.partialorder %v598_v12, 0.0  ;;  %vm603_vm0 = vcmp.ge.f32.partialorder %v599_v17, 0.0  ;;  %vm604_vm1 = vcmp.ge.f32.partialorder %v600_v20, 0.0  ;;  %vm605_vm2 = vcmp.ge.f32.partialorder %v601_v13, 0.0 }
 0x51c   :  { %v606_v14 = vmul.f32 %v598_v12, %v885_v38  ;;  %v607_v15 = vmul.f32 %v599_v17, %v885_v38  ;;  %v608_v16 = vmul.f32 %v600_v20, %v885_v38  ;;  %v609_v1 = vmul.f32 %v601_v13, %v885_v38 }
 0x51e   :  { %v610_v3 = vsel %vm602_vm15, %v598_v12, %v606_v14  ;;  %v611_v18 = vsel %vm603_vm0, %v599_v17, %v607_v15  ;;  %v612_v2 = vsel %vm604_vm1, %v600_v20, %v608_v16  ;;  %v613_v19 = vsel %vm605_vm2, %v601_v13, %v609_v1 }
 0x51f   :  { %614 = vst [vmem:[#allocation3] sm:$0xff] %v610_v3  ;;  %616 = vst [vmem:[#allocation3 + $0x8] sm:$0xff] %v611_v18 }
 0x520   :  { %618 = vst [vmem:[#allocation3 + $0x10] sm:$0xff] %v612_v2  ;;  %620 = vst [vmem:[#allocation3 + $0x18] sm:$0xff] %v613_v19 }
 0x521   :  { %692 = shalt.err (!%p689_p4)
}
 0x522   :  { %s693_s16 = scalar_lea.hbm %s967_s10, 512 }
 0x523   :  { %p694_p5 = scmp.ne.s32.totalorder %s967_s10, %s693_s16  ;;  %p697_p6 = scmp.lt.u32.totalorder %s693_s16, %s967_s10 }
 0x525   :  { %p699_p7 = pnand %p697_p6, %p694_p5 }
 0x527   :  { %702 = shalt.err (!%p699_p7)
}
 0x528   :  { %s710_s21 = smov 128   ;;  %s711_s22 = smov 8  }
 0x529   :  { %632 = dma.vmem_to_hbm [thread:$0]  %s627_s8, 512, %s967_s10, [#allocation4], %s710_s21, %s710_s21, %s711_s22  }
 0x52a   :  { %703 = dma.done.wait [#allocation4], 512  }
 0x52b   :  { %704 = vsyncadd [#allocation4], 4294966784 }
 0x52c   :  { %636 = vsyncpa [#allocation4], 1 }

</bundles_post_ra>
